<compile_context>
chip_gen: v5e
topology: v5e:2x2
jax: 0.10.0
libtpu: 0.0.40
codegen_flags: <defaults>
</compile_context>

<pallas_src>
import numpy as np
import jax
import jax.numpy as jnp
from jax.experimental import pallas as pl
from jax.experimental.pallas import tpu as pltpu

REG_MAX = 16
BINS = REG_MAX + 1          # 17
GROUPS = 4                  # ltrb
WIDTH = GROUPS * BINS       # 68


def _make_projection_matrix(bins):
    """Constant (4*bins, 8) matrix: cols 0..3 = per-group ones (-> denominator),
    cols 4..7 = per-group linspace(0, reg_max) (-> weighted numerator)."""
    width = GROUPS * bins
    cols = np.arange(width)
    g = cols // bins
    k = (cols % bins).astype(np.float32)
    w = np.zeros((width, 2 * GROUPS), np.float32)
    w[cols, g] = 1.0
    w[cols, GROUPS + g] = k
    return jnp.asarray(w)


def _project_kernel(x_ref, w_ref, o_ref):
    # x_ref: (tm, 4*bins) natural-layout tile; w_ref: (4*bins, 8) constant.
    x = x_ref[...].astype(jnp.float32)
    # Per-row max over all 4 groups: a single XLU lane reduce per 8 rows.
    # (Softmax is shift-invariant per group, so one shared shift is exact.)
    m = jnp.max(x, axis=-1, keepdims=True)                       # (tm, 1)
    e = jnp.exp(x - m)                                           # (tm, 68) EUP
    # One MXU matmul computes all 8 segmented sums (4x den, 4x num).
    r = jnp.dot(e, w_ref[...], preferred_element_type=jnp.float32)   # (tm, 8)
    den = jnp.maximum(r[:, 0:GROUPS], 1e-30)   # clamp: never NaN even if a
    num = r[:, GROUPS:2 * GROUPS]              # whole group underflows
    # EUP approximate reciprocal + one Newton-Raphson step (~f32 accurate),
    # applied only to the (tm, 4) denominator.
    inv = pl.reciprocal(den, approx=True)
    inv = inv * (2.0 - den * inv)
    o_ref[...] = (num * inv).astype(o_ref.dtype)


def project_forward(x, reg_max=REG_MAX, block_rows=8192):
    """Pallas equivalent of Project.forward. Returns shape (-1, 4)."""
    bins = reg_max + 1
    width = GROUPS * bins
    assert x.size % width == 0, "total elements must be divisible by 4*(reg_max+1)"

    # Row-major flatten to (N, 4*bins): identical grouping to the torch
    # reshape(-1, bins) -> reshape(-1, 4) chain, and a no-op for the canonical
    # (num_points, 4*(reg_max+1)) GFL input. No transpose, no pad.
    x2 = x.reshape(-1, width)
    n = x2.shape[0]
    w = _make_projection_matrix(bins)

    # Block sizing: block_rows (multiple of 8) rows per step; for small inputs
    # use the full row extent (block dim == array dim is always legal). The
    # last block of a large input may be ragged -- Pallas masks it.
    tm = block_rows if n > block_rows else n
    grid = pl.cdiv(n, tm)

    out = pl.pallas_call(
        _project_kernel,
        out_shape=jax.ShapeDtypeStruct((n, GROUPS), x.dtype),
        grid=(grid,),
        in_specs=[
            pl.BlockSpec((tm, width), lambda i: (i, 0)),
            pl.BlockSpec((width, 2 * GROUPS), lambda i: (0, 0)),
        ],
        out_specs=pl.BlockSpec((tm, GROUPS), lambda i: (i, 0)),
        compiler_params=pltpu.CompilerParams(
            dimension_semantics=("parallel",),
            vmem_limit_bytes=32 * 1024 * 1024,
        ),
    )(x2, w)
    return out


def project_reference(x, reg_max=REG_MAX):
    bins = reg_max + 1
    x2 = x.reshape(-1, bins).astype(jnp.float32)
    p = jax.nn.softmax(x2, axis=1)
    proj = jnp.arange(bins, dtype=jnp.float32)
    return (p @ proj).astype(x.dtype).reshape(-1, 4)


if __name__ == "__main__":
    key = jax.random.PRNGKey(0)
    # typical GFL usage: (num_points, 4*(reg_max+1)) bbox distribution logits
    x = jax.random.normal(key, (128, WIDTH), dtype=jnp.float32)

    out = jax.block_until_ready(project_forward(x))
    ref = project_reference(x)

    assert out.shape == ref.shape, (out.shape, ref.shape)
    assert jnp.allclose(out, ref, atol=1e-4, rtol=1e-4), "mismatch vs reference"

    print("KERNEL_OK")
</pallas_src>

<mosaic_0001>
module attributes {stable_mosaic.version = 11 : i64} {
  func.func @_project_kernel(%arg0: i32, %arg1: memref<128x68xf32, #tpu.memory_space<vmem>>, %arg2: memref<68x8xf32, #tpu.memory_space<vmem>>, %arg3: memref<128x4xf32, #tpu.memory_space<vmem>>) attributes {dimension_semantics = [#tpu.dimension_semantics<parallel>], iteration_bounds = array<i64: 1>, scalar_prefetch = 0 : i64, scratch_operands = 0 : i64, tpu.core_type = #tpu.core_type<tc>, window_params = [{transform_indices = @transform_0, window_bounds = array<i64: 128, 68>}, {pipeline_mode = #tpu.pipeline_mode<synchronous>, transform_indices = @transform_1, window_bounds = array<i64: 68, 8>}, {transform_indices = @transform_2, window_bounds = array<i64: 128, 4>}]} {
    %c0 = arith.constant 0 : index
    %c0_0 = arith.constant 0 : index
    %0 = vector.load %arg1[%c0, %c0_0] : memref<128x68xf32, #tpu.memory_space<vmem>>, vector<128x68xf32>
    %cst = arith.constant dense<0xFF800000> : vector<128xf32>
    %1 = vector.multi_reduction <maximumf>, %0, %cst [1] : vector<128x68xf32> to vector<128xf32>
    %2 = vector.shape_cast %1 : vector<128xf32> to vector<128x1xf32>
    %3 = vector.broadcast %2 : vector<128x1xf32> to vector<128x68xf32>
    %4 = arith.subf %0, %3 : vector<128x68xf32>
    %5 = math.exp %4 : vector<128x68xf32>
    %c0_1 = arith.constant 0 : index
    %c0_2 = arith.constant 0 : index
    %6 = vector.load %arg2[%c0_1, %c0_2] : memref<68x8xf32, #tpu.memory_space<vmem>>, vector<68x8xf32>
    %cst_3 = arith.constant dense<0.000000e+00> : vector<128x8xf32>
    %7 = tpu.matmul %5, %6, %cst_3 {dimension_numbers = #tpu.dot_dimension_numbers<[1], [0], [0], [1], [0, 0, 1, 1], [], []>} : vector<128x68xf32>, vector<68x8xf32>, vector<128x8xf32> -> vector<128x8xf32>
    %8 = vector.extract_strided_slice %7 {offsets = [0, 0], sizes = [128, 4], strides = [1, 1]} : vector<128x8xf32> to vector<128x4xf32>
    %cst_4 = arith.constant 1.000000e-30 : f32
    %9 = vector.broadcast %cst_4 : f32 to vector<128x4xf32>
    %10 = arith.maximumf %8, %9 : vector<128x4xf32>
    %11 = vector.extract_strided_slice %7 {offsets = [0, 4], sizes = [128, 4], strides = [1, 1]} : vector<128x8xf32> to vector<128x4xf32>
    %12 = tpu.reciprocal %10 {approx = true} : vector<128x4xf32> -> vector<128x4xf32>
    %13 = arith.mulf %10, %12 : vector<128x4xf32>
    %cst_5 = arith.constant 2.000000e+00 : f32
    %14 = vector.broadcast %cst_5 : f32 to vector<128x4xf32>
    %15 = arith.subf %14, %13 : vector<128x4xf32>
    %16 = arith.mulf %12, %15 : vector<128x4xf32>
    %17 = arith.mulf %11, %16 : vector<128x4xf32>
    %c0_6 = arith.constant 0 : index
    %c0_7 = arith.constant 0 : index
    %18 = vector.load %arg3[%c0_6, %c0_7] : memref<128x4xf32, #tpu.memory_space<vmem>>, vector<128x4xf32>
    tpu.vector_store %arg3[%c0_6, %c0_7], %17 {strides = array<i32>} : memref<128x4xf32, #tpu.memory_space<vmem>>, vector<128x4xf32>,
    return
  }
  func.func @transform_0(%arg0: i32) -> (i32, i32) {
    %c0_i32 = arith.constant 0 : i32
    %c0_i32_0 = arith.constant 0 : i32
    return %arg0, %c0_i32 : i32, i32
  }
  func.func @transform_1(%arg0: i32) -> (i32, i32) {
    %c0_i32 = arith.constant 0 : i32
    %c0_i32_0 = arith.constant 0 : i32
    %c0_i32_1 = arith.constant 0 : i32
    return %c0_i32, %c0_i32_0 : i32, i32
  }
  func.func @transform_2(%arg0: i32) -> (i32, i32) {
    %c0_i32 = arith.constant 0 : i32
    %c0_i32_0 = arith.constant 0 : i32
    return %arg0, %c0_i32 : i32, i32
  }
}

</mosaic_0001>

<bundles_post_ra>
// kernel: tpu_custom_call.1
= control target key start
LH: loop header
LB: loop body
LE: loop exit
PB: predicated region body
PF: predicated region fallthrough
CT: control target
= control target key end

     0   :  { %vm27_vm0 = vcmask 556032   ;;  %vm181_vm1 = vcmask 1043456   ;;  %s606_s30 = smov 124   ;;  %vm474_vm2 = vcmask 31744   ;;  %s953_s0 = inlined_call_operand.vmem [shape: f32[128,68], index: 0, kind: input, shape index: {}]   ;;  %s954_s1 = inlined_call_operand.vmem [shape: f32[68,8], index: 1, kind: input, shape index: {}]   ;;  %s955_s2 = inlined_call_operand.vmem [shape: f32[128,4], index: 2, kind: output, shape index: {}]  }
   0x1   :  { %v625_v0 = vld [vmem:[%s953_s0 + $0x40] sm:$0xff]  ;;  %v635_v2 = vld [vmem:[%s953_s0 + $0x48] sm:$0xff]  ;;  %v131_v13 = vld [vmem:[%s954_s1 + $0x38] sm:$0xff] }
   0x2   :  { %v630_v1 = vld [vmem:[%s953_s0] sm:$0xff]  ;;  %v52_v3 = vsel %vm27_vm0, %v625_v0, -inf  ;;  %v55_v5 = vsel %vm27_vm0, %v635_v2, -inf  ;;  %v656_v8 = vld [vmem:[%s953_s0 + $0x68] sm:$0xff]  ;;  %v130_v16 = vld [vmem:[%s954_s1 + $0x30] sm:$0xff] }
   0x3   :  { %v28_v4 = vsel %vm27_vm0, %v630_v1, -inf  ;;  %53 = vmax.xlane.f32.xlu0 %v52_v3  ;;  %56 = vmax.xlane.f32.xlu2 %v55_v5  ;;  %v646_v6 = vld [vmem:[%s953_s0 + $0x60] sm:$0xff]  ;;  %v67_v11 = vsel %vm27_vm0, %v656_v8, -inf  ;;  %v673_v14 = vld [vmem:[%s953_s0 + $0x8] sm:$0xff]  ;;  %v686_v17 = vld [vmem:[%s953_s0 + $0x50] sm:$0xff] }
   0x4   :  { %29 = vmax.xlane.f32.xlu1 %v28_v4  ;;  %v651_v7 = vld [vmem:[%s953_s0 + $0x20] sm:$0xff]  ;;  %v64_v9 = vsel %vm27_vm0, %v646_v6, -inf  ;;  %v678_v15 = vld [vmem:[%s953_s0 + $0x28] sm:$0xff]  ;;  %v31_v18 = vsel %vm27_vm0, %v673_v14, -inf  ;;  %v58_v20 = vsel %vm27_vm0, %v686_v17, -inf  ;;  %v697_v21 = vld [vmem:[%s953_s0 + $0x70] sm:$0xff] }
   0x5   :  { %v40_v10 = vsel %vm27_vm0, %v651_v7, -inf  ;;  %v132_v12 = vld [vmem:[%s954_s1 + $0x40] sm:$0xf]  ;;  %v43_v19 = vsel %vm27_vm0, %v678_v15, -inf  ;;  %v702_v22 = vld [vmem:[%s953_s0 + $0x10] sm:$0xff]  ;;  %v70_v24 = vsel %vm27_vm0, %v697_v21, -inf }
   0x6   :  { %495 = vmatpush.msk.msra.mxu0 %vm181_vm1, %v132_v12  ;;  %513 = vmatpush.msk.msra.mxu2 %vm181_vm1, %v132_v12  ;;  %v707_v23 = vld [vmem:[%s953_s0 + $0x30] sm:$0xff]  ;;  %v34_v25 = vsel %vm27_vm0, %v702_v22, -inf  ;;  %v718_v27 = vld [vmem:[%s953_s0 + $0x58] sm:$0xff]  ;;  %v129_v35 = vld [vmem:[%s954_s1 + $0x28] sm:$0xff] }
   0x7   :  { %512 = vmatpush.msk.msra.mxu1 %vm181_vm1, %v132_v12  ;;  %514 = vmatpush.msk.msra.mxu3 %vm181_vm1, %v132_v12  ;;  %v46_v26 = vsel %vm27_vm0, %v707_v23, -inf  ;;  %v723_v28 = vld [vmem:[%s953_s0 + $0x78] sm:$0xff]  ;;  %v61_v30 = vsel %vm27_vm0, %v718_v27, -inf  ;;  %v128_v36 = vld [vmem:[%s954_s1 + $0x20] sm:$0xff]  ;;  %v126_v38 = vld [vmem:[%s954_s1 + $0x10] sm:$0xff] }
   0x8   :  { %193 = vmatpush.msra.mxu0 %v131_v13  ;;  %516 = vmatpush.msra.mxu2 %v131_v13  ;;  %v728_v29 = vld [vmem:[%s953_s0 + $0x18] sm:$0xff]  ;;  %v73_v31 = vsel %vm27_vm0, %v723_v28, -inf  ;;  %v125_v39 = vld [vmem:[%s954_s1 + $0x8] sm:$0xff]  ;;  %v124_v40 = vld [vmem:[%s954_s1] sm:$0xff] }
   0x9   :  { %515 = vmatpush.msra.mxu1 %v131_v13  ;;  %517 = vmatpush.msra.mxu3 %v131_v13  ;;  %v37_v32 = vsel %vm27_vm0, %v728_v29, -inf  ;;  %v739_v33 = vld [vmem:[%s953_s0 + $0x38] sm:$0xff] }
   0xa   :  { %194 = vmatpush.msra.mxu0 %v130_v16  ;;  %519 = vmatpush.msra.mxu2 %v130_v16  ;;  %v49_v34 = vsel %vm27_vm0, %v739_v33, -inf  ;;  %v127_v37 = vld [vmem:[%s954_s1 + $0x18] sm:$0xff]  ;;  %s605_s1 = smov 4  }
   0xb   :  { %65 = vmax.xlane.f32.xlu0 %v64_v9  ;;  %68 = vmax.xlane.f32.xlu2 %v67_v11 }
   0xc   :  { %41 = vmax.xlane.f32.xlu1 %v40_v10  ;;  %518 = vmatpush.msra.mxu1 %v130_v16 }
   0xd   :  { %520 = vmatpush.msra.mxu3 %v130_v16  ;;  %195 = vmatpush.msra.mxu0 %v129_v35 }
   0xe   :  { %522 = vmatpush.msra.mxu2 %v129_v35  ;;  %521 = vmatpush.msra.mxu1 %v129_v35 }
   0xf   :  { %523 = vmatpush.msra.mxu3 %v129_v35  ;;  %196 = vmatpush.msra.mxu0 %v128_v36 }
  0x10   :  { %525 = vmatpush.msra.mxu2 %v128_v36  ;;  %524 = vmatpush.msra.mxu1 %v128_v36 }
  0x11   :  { %526 = vmatpush.msra.mxu3 %v128_v36  ;;  %197 = vmatpush.msra.mxu0 %v127_v37 }
  0x12   :  { %528 = vmatpush.msra.mxu2 %v127_v37  ;;  %527 = vmatpush.msra.mxu1 %v127_v37 }
  0x13   :  { %32 = vmax.xlane.f32.xlu0 %v31_v18  ;;  %59 = vmax.xlane.f32.xlu2 %v58_v20 }
  0x14   :  { %44 = vmax.xlane.f32.xlu1 %v43_v19  ;;  %529 = vmatpush.msra.mxu3 %v127_v37 }
  0x15   :  { %198 = vmatpush.msra.mxu0 %v126_v38  ;;  %531 = vmatpush.msra.mxu2 %v126_v38 }
  0x16   :  { %530 = vmatpush.msra.mxu1 %v126_v38  ;;  %532 = vmatpush.msra.mxu3 %v126_v38 }
  0x17   :  { %199 = vmatpush.msra.mxu0 %v125_v39  ;;  %534 = vmatpush.msra.mxu2 %v125_v39 }
  0x18   :  { %533 = vmatpush.msra.mxu1 %v125_v39  ;;  %535 = vmatpush.msra.mxu3 %v125_v39 }
  0x19   :  { %200 = vmatpush.msra.mxu0 %v124_v40  ;;  %537 = vmatpush.msra.mxu2 %v124_v40 }
  0x1a   :  { %536 = vmatpush.msra.mxu1 %v124_v40  ;;  %538 = vmatpush.msra.mxu3 %v124_v40 }
  0x1b   :  { %71 = vmax.xlane.f32.xlu0 %v70_v24  ;;  %47 = vmax.xlane.f32.xlu2 %v46_v26 }
  0x1c   :  { %35 = vmax.xlane.f32.xlu1 %v34_v25 }
  0x23   :  { %62 = vmax.xlane.f32.xlu0 %v61_v30  ;;  %38 = vmax.xlane.f32.xlu2 %v37_v32 }
  0x24   :  { %74 = vmax.xlane.f32.xlu1 %v73_v31 }
  0x2b   :  { %50 = vmax.xlane.f32.xlu0 %v49_v34 }
  0x76   :  { %v54_v41 = vpop.xlane.xlu0 %53  ;;  %v57_v45 = vpop.xlane.xlu2 %56 }
  0x77   :  { %v30_v42 = vpop.xlane.xlu1 %29  ;;  %v84_v43 = vsub.f32 %v625_v0, %v54_v41  ;;  %v85_v48 = vsub.f32 %v635_v2, %v57_v45 }
  0x78   :  { %v76_v44 = vsub.f32 %v630_v1, %v30_v42 }
  0x79   :  { %v108_v46 = vmul.f32 1.442695, %v84_v43  ;;  %v110_v49 = vmul.f32 1.442695, %v85_v48 }
  0x7a   :  { %v92_v47 = vmul.f32 1.442695, %v76_v44 }
  0x7b   :  { %541 = vpow2.f32 %v108_v46 }
  0x7c   :  { %543 = vpow2.f32 %v92_v47 }
  0x7d   :  { %545 = vpow2.f32 %v110_v49 }
  0x7e   :  { %v66_v50 = vpop.xlane.xlu0 %65  ;;  %v69_v54 = vpop.xlane.xlu2 %68 }
  0x7f   :  { %v42_v51 = vpop.xlane.xlu1 %41  ;;  %v88_v52 = vsub.f32 %v646_v6, %v66_v50  ;;  %v89_v58 = vsub.f32 %v656_v8, %v69_v54 }
  0x80   :  { %v80_v53 = vsub.f32 %v651_v7, %v42_v51 }
  0x81   :  { %v542_v55 = vpop.eup %541  ;;  %v116_v56 = vmul.f32 1.442695, %v88_v52  ;;  %v118_v60 = vmul.f32 1.442695, %v89_v58 }
  0x82   :  { %v100_v57 = vmul.f32 1.442695, %v80_v53  ;;  %v544_v59 = vpop.eup %543  ;;  %504 = vmatmul.msk.f32.vlgmr.msra.gmra.mxu2 %vm27_vm0, %v542_v55 }
  0x83   :  { %547 = vpow2.f32 %v116_v56  ;;  %496 = vmatmul.msk.f32.vlgmr.msra.gmra.mxu0 %vm27_vm0, %v544_v59  ;;  %v546_v63 = vpop.eup %545 }
  0x84   :  { %549 = vpow2.f32 %v100_v57 }
  0x85   :  { %551 = vpow2.f32 %v118_v60 }
  0x86   :  { %v33_v61 = vpop.xlane.xlu0 %32  ;;  %v60_v2 = vpop.xlane.xlu2 %59 }
  0x87   :  { %v45_v62 = vpop.xlane.xlu1 %44  ;;  %v77_v0 = vsub.f32 %v673_v14, %v33_v61  ;;  %v86_v3 = vsub.f32 %v686_v17, %v60_v2 }
  0x88   :  { %v81_v1 = vsub.f32 %v678_v15, %v45_v62 }
  0x89   :  { %v548_v4 = vpop.eup %547  ;;  %v94_v5 = vmul.f32 1.442695, %v77_v0  ;;  %v112_v8 = vmul.f32 1.442695, %v86_v3 }
  0x8a   :  { %v102_v6 = vmul.f32 1.442695, %v81_v1  ;;  %v550_v7 = vpop.eup %549  ;;  %505 = vmatmul.msk.f32.gmra.mxu2 %vm27_vm0, %v546_v63  ;;  %508 = vmatmul.msk.f32.vlgmr.msra.gmra.mxu3 %vm27_vm0, %v548_v4 }
  0x8b   :  { %553 = vpow2.f32 %v94_v5  ;;  %500 = vmatmul.msk.f32.vlgmr.msra.gmra.mxu1 %vm27_vm0, %v550_v7  ;;  %v552_v11 = vpop.eup %551 }
  0x8c   :  { %555 = vpow2.f32 %v102_v6 }
  0x8d   :  { %557 = vpow2.f32 %v112_v8 }
  0x8e   :  { %v72_v9 = vpop.xlane.xlu0 %71  ;;  %v48_v14 = vpop.xlane.xlu2 %47 }
  0x8f   :  { %v36_v10 = vpop.xlane.xlu1 %35  ;;  %v90_v12 = vsub.f32 %v697_v21, %v72_v9  ;;  %v82_v15 = vsub.f32 %v707_v23, %v48_v14 }
  0x90   :  { %v78_v13 = vsub.f32 %v702_v22, %v36_v10 }
  0x91   :  { %v554_v16 = vpop.eup %553  ;;  %v120_v17 = vmul.f32 1.442695, %v90_v12  ;;  %v104_v20 = vmul.f32 1.442695, %v82_v15 }
  0x92   :  { %v96_v18 = vmul.f32 1.442695, %v78_v13  ;;  %v556_v19 = vpop.eup %555  ;;  %497 = vmatmul.msk.f32.gmra.mxu0 %vm27_vm0, %v554_v16  ;;  %509 = vmatmul.msk.f32.gmra.mxu3 %vm27_vm0, %v552_v11 }
  0x93   :  { %v558_v24 = vpop.eup %557  ;;  %559 = vpow2.f32 %v120_v17  ;;  %501 = vmatmul.msk.f32.gmra.mxu1 %vm27_vm0, %v556_v19 }
  0x94   :  { %561 = vpow2.f32 %v96_v18  ;;  %506 = vmatmul.msk.f32.gmra.mxu2 %vm27_vm0, %v558_v24 }
  0x95   :  { %563 = vpow2.f32 %v104_v20 }
  0x96   :  { %v63_v21 = vpop.xlane.xlu0 %62  ;;  %v39_v25 = vpop.xlane.xlu2 %38 }
  0x97   :  { %v75_v22 = vpop.xlane.xlu1 %74  ;;  %v87_v23 = vsub.f32 %v718_v27, %v63_v21  ;;  %v79_v30 = vsub.f32 %v728_v29, %v39_v25 }
  0x98   :  { %v91_v26 = vsub.f32 %v723_v28, %v75_v22 }
  0x99   :  { %v560_v31 = vpop.eup %559  ;;  %v114_v32 = vmul.f32 1.442695, %v87_v23  ;;  %v98_v36 = vmul.f32 1.442695, %v79_v30 }
  0x9a   :  { %v122_v34 = vmul.f32 1.442695, %v91_v26  ;;  %v562_v35 = vpop.eup %561  ;;  %510 = vmatmul.msk.f32.gmra.mxu3 %vm27_vm0, %v560_v31 }
  0x9b   :  { %v564_v37 = vpop.eup %563  ;;  %565 = vpow2.f32 %v114_v32  ;;  %498 = vmatmul.msk.f32.gmra.mxu0 %vm27_vm0, %v562_v35 }
  0x9c   :  { %502 = vmatmul.msk.f32.gmra.mxu1 %vm27_vm0, %v564_v37  ;;  %567 = vpow2.f32 %v98_v36 }
  0x9d   :  { %569 = vpow2.f32 %v122_v34 }
  0x9e   :  { %v51_v27 = vpop.xlane.xlu0 %50 }
  0x9f   :  { %v83_v28 = vsub.f32 %v739_v33, %v51_v27 }
  0xa1   :  { %v566_v38 = vpop.eup %565  ;;  %v106_v29 = vmul.f32 1.442695, %v83_v28 }
  0xa2   :  { %v568_v39 = vpop.eup %567  ;;  %507 = vmatmul.msk.f32.gmra.mxu2 %vm27_vm0, %v566_v38 }
  0xa3   :  { %v570_v40 = vpop.eup %569  ;;  %571 = vpow2.f32 %v106_v29  ;;  %499 = vmatmul.msk.f32.gmra.mxu0 %vm27_vm0, %v568_v39 }
  0xa4   :  { %511 = vmatmul.msk.f32.gmra.mxu3 %vm27_vm0, %v570_v40 }
  0xa9   :  { %v572_v41 = vpop.eup %571 }
  0xaa   :  { %503 = vmatmul.msk.f32.gmra.mxu1 %vm27_vm0, %v572_v41 }
 0x100   :  { %v793_v42 = vpop.f32.mrf.mxu0 }
 0x101   :  { %v250_v43 = vmax.f32 %v793_v42, 1e-30 }
 0x103   :  { %573 = vrcp.f32 %v250_v43 }
 0x105   :  { %v796_v33 = vpop.f32.mrf.mxu2 }
 0x106   :  { %v258_v44 = vmax.f32 %v796_v33, 1e-30 }
 0x108   :  { %575 = vrcp.f32 %v258_v44  ;;  %v799_v45 = vpop.f32.mrf.mxu1 }
 0x109   :  { %v574_v46 = vpop.eup %573  ;;  %v254_v47 = vmax.f32 %v799_v45, 1e-30 }
 0x10a   :  { %v282_v48 = vmul.f32 %v574_v46, %v250_v43 }
 0x10b   :  { %577 = vrcp.f32 %v254_v47 }
 0x10c   :  { %v298_v49 = vsub.f32 2.0, %v282_v48 }
 0x10d   :  { %v802_v50 = vpop.f32.mrf.mxu2  ;;  %v804_v51 = vpop.f32.mrf.mxu3 }
 0x10e   :  { %v576_v52 = vpop.eup %575  ;;  %v262_v53 = vmax.f32 %v804_v51, 1e-30  ;;  %v314_v54 = vmul.f32 %v574_v46, %v298_v49  ;;  %v259_v1 = vmax.f32 %v802_v50, 1e-30 }
 0x10f   :  { %v290_v55 = vmul.f32 %v576_v52, %v258_v44  ;;  %v807_v56 = vpop.f32.mrf.mxu0 }
 0x110   :  { %346 = vrot.lane.b32.xlu1 %v314_v54, %s605_s1  ;;  %v251_v57 = vmax.f32 %v807_v56, 1e-30  ;;  %v811_v58 = vpop.f32.mrf.mxu1  ;;  %579 = vrcp.f32 %v262_v53 }
 0x111   :  { %v578_v59 = vpop.eup %577  ;;  %v306_v60 = vsub.f32 2.0, %v290_v55  ;;  %v255_v61 = vmax.f32 %v811_v58, 1e-30 }
 0x112   :  { %v286_v62 = vmul.f32 %v578_v59, %v254_v47  ;;  %581 = vrcp.f32 %v251_v57 }
 0x113   :  { %583 = vrcp.f32 %v255_v61  ;;  %v322_v63 = vmul.f32 %v576_v52, %v306_v60 }
 0x114   :  { %v302_v0 = vsub.f32 2.0, %v286_v62 }
 0x115   :  { %v815_v2 = vpop.f32.mrf.mxu3  ;;  %362 = vrot.lane.b32.xlu0 %v322_v63, %s605_s1 }
 0x116   :  { %v263_v3 = vmax.f32 %v815_v2, 1e-30  ;;  %v318_v4 = vmul.f32 %v578_v59, %v302_v0  ;;  %v580_v5 = vpop.eup %579 }
 0x117   :  { %v819_v6 = vpop.f32.mrf.mxu2  ;;  %v294_v8 = vmul.f32 %v580_v5, %v262_v53 }
 0x118   :  { %v582_v7 = vpop.eup %581  ;;  %585 = vrcp.f32 %v263_v3  ;;  %v260_v9 = vmax.f32 %v819_v6, 1e-30  ;;  %354 = vrot.lane.b32.xlu1 %v318_v4, %s605_s1  ;;  %v823_v10 = vpop.f32.mrf.mxu0 }
 0x119   :  { %v584_v11 = vpop.eup %583  ;;  %587 = vrcp.f32 %v259_v1  ;;  %v252_v12 = vmax.f32 %v823_v10, 1e-30  ;;  %v310_v13 = vsub.f32 2.0, %v294_v8  ;;  %v283_v15 = vmul.f32 %v582_v7, %v251_v57  ;;  %v826_v17 = vpop.f32.mrf.mxu1 }
 0x11a   :  { %v287_v14 = vmul.f32 %v584_v11, %v255_v61  ;;  %589 = vrcp.f32 %v260_v9  ;;  %v256_v22 = vmax.f32 %v826_v17, 1e-30 }
 0x11b   :  { %591 = vrcp.f32 %v252_v12  ;;  %v326_v18 = vmul.f32 %v580_v5, %v310_v13  ;;  %v299_v25 = vsub.f32 2.0, %v283_v15 }
 0x11c   :  { %v303_v16 = vsub.f32 2.0, %v287_v14  ;;  %593 = vrcp.f32 %v256_v22 }
 0x11d   :  { %370 = vrot.lane.b32.xlu2 %v326_v18, %s605_s1  ;;  %v830_v26 = vpop.f32.mrf.mxu3  ;;  %v315_v38 = vmul.f32 %v582_v7, %v299_v25 }
 0x11e   :  { %v586_v19 = vpop.eup %585  ;;  %v319_v20 = vmul.f32 %v584_v11, %v303_v16  ;;  %v264_v36 = vmax.f32 %v830_v26, 1e-30 }
 0x11f   :  { %v588_v24 = vpop.eup %587  ;;  %v295_v21 = vmul.f32 %v586_v19, %v263_v3 }
 0x120   :  { %v590_v23 = vpop.eup %589  ;;  %356 = vrot.lane.b32.xlu0 %v319_v20, %s605_s1  ;;  %v833_v34 = vpop.f32.mrf.mxu0  ;;  %v291_v27 = vmul.f32 %v588_v24, %v259_v1  ;;  %595 = vrcp.f32 %v264_v36 }
 0x121   :  { %v592_v30 = vpop.eup %591  ;;  %v311_v31 = vsub.f32 2.0, %v295_v21  ;;  %v292_v35 = vmul.f32 %v590_v23, %v260_v9  ;;  %v253_v39 = vmax.f32 %v833_v34, 1e-30 }
 0x122   :  { %v284_v32 = vmul.f32 %v592_v30, %v252_v12  ;;  %v307_v46 = vsub.f32 2.0, %v291_v27  ;;  %v594_v48 = vpop.eup %593 }
 0x123   :  { %v327_v37 = vmul.f32 %v586_v19, %v311_v31  ;;  %v308_v43 = vsub.f32 2.0, %v292_v35  ;;  %v288_v53 = vmul.f32 %v594_v48, %v256_v22 }
 0x124   :  { %v300_v28 = vsub.f32 2.0, %v284_v32  ;;  %v323_v54 = vmul.f32 %v588_v24, %v307_v46 }
 0x125   :  { %v836_v29 = vpop.f32.mrf.mxu2  ;;  %372 = vrot.lane.b32.xlu1 %v327_v37, %s605_s1  ;;  %348 = vrot.lane.b32.xlu2 %v315_v38, %s605_s1  ;;  %v324_v52 = vmul.f32 %v590_v23, %v308_v43  ;;  %v304_v63 = vsub.f32 2.0, %v288_v53 }
 0x126   :  { %v261_v40 = vmax.f32 %v836_v29, 1e-30  ;;  %v316_v41 = vmul.f32 %v592_v30, %v300_v28  ;;  %v596_v55 = vpop.eup %595 }
 0x127   :  { %v842_v44 = vpop.f32.mrf.mxu1  ;;  %v846_v49 = vpop.f32.mrf.mxu3  ;;  %v296_v4 = vmul.f32 %v596_v55, %v264_v36  ;;  %v320_v8 = vmul.f32 %v594_v48, %v304_v63 }
 0x128   :  { %597 = vrcp.f32 %v261_v40  ;;  %v257_v47 = vmax.f32 %v842_v44, 1e-30  ;;  %350 = vrot.lane.b32.xlu0 %v316_v41, %s605_s1  ;;  %v265_v57 = vmax.f32 %v846_v49, 1e-30 }
 0x129   :  { %599 = vrcp.f32 %v253_v39  ;;  %v312_v13 = vsub.f32 2.0, %v296_v4 }
 0x12a   :  { %601 = vrcp.f32 %v257_v47 }
 0x12b   :  { %603 = vrcp.f32 %v265_v57  ;;  %v328_v16 = vmul.f32 %v596_v55, %v312_v13 }
 0x12d   :  { %366 = vrot.lane.b32.xlu1 %v324_v52, %s605_s1  ;;  %364 = vrot.lane.b32.xlu2 %v323_v54, %s605_s1 }
 0x12e   :  { %v598_v59 = vpop.eup %597 }
 0x12f   :  { %v600_v60 = vpop.eup %599  ;;  %v293_v61 = vmul.f32 %v598_v59, %v261_v40 }
 0x130   :  { %v602_v62 = vpop.eup %601  ;;  %v285_v3 = vmul.f32 %v600_v60, %v253_v39 }
 0x131   :  { %v309_v0 = vsub.f32 2.0, %v293_v61  ;;  %v289_v1 = vmul.f32 %v602_v62, %v257_v47  ;;  %v604_v12 = vpop.eup %603 }
 0x132   :  { %v301_v11 = vsub.f32 2.0, %v285_v3  ;;  %v297_v14 = vmul.f32 %v604_v12, %v265_v57 }
 0x133   :  { %v305_v5 = vsub.f32 2.0, %v289_v1  ;;  %v325_v7 = vmul.f32 %v598_v59, %v309_v0 }
 0x134   :  { %v317_v15 = vmul.f32 %v600_v60, %v301_v11  ;;  %v313_v18 = vsub.f32 2.0, %v297_v14 }
 0x135   :  { %368 = vrot.lane.b32.xlu0 %v325_v7, %s605_s1  ;;  %v321_v9 = vmul.f32 %v602_v62, %v305_v5  ;;  %358 = vrot.lane.b32.xlu2 %v320_v8, %s605_s1 }
 0x136   :  { %v329_v19 = vmul.f32 %v604_v12, %v313_v18 }
 0x137   :  { %360 = vrot.lane.b32.xlu1 %v321_v9, %s605_s1 }
 0x13d   :  { %374 = vrot.lane.b32.xlu0 %v328_v16, %s605_s1  ;;  %352 = vrot.lane.b32.xlu2 %v317_v15, %s605_s1 }
 0x145   :  { %376 = vrot.lane.b32.xlu2 %v329_v19, %s605_s1 }
 0x177   :  { %v371_v20 = vpop.permute.xlu2 %370 }
 0x178   :  { %v406_v32 = vmul.f32 %v371_v20, %v804_v51 }
 0x17f   :  { %v349_v24 = vpop.permute.xlu2 %348 }
 0x180   :  { %v395_v27 = vmul.f32 %v349_v24, %v807_v56 }
 0x182   :  { %v347_v21 = vpop.permute.xlu1 %346 }
 0x183   :  { %v394_v22 = vmul.f32 %v347_v21, %v793_v42 }
 0x185   :  { %426 = vrot.lane.b32.xlu1 %v394_v22, %s606_s30 }
 0x187   :  { %v363_v23 = vpop.permute.xlu0 %362  ;;  %v365_v30 = vpop.permute.xlu2 %364 }
 0x188   :  { %v402_v25 = vmul.f32 %v363_v23, %v796_v33  ;;  %v403_v42 = vmul.f32 %v365_v30, %v802_v50 }
 0x18a   :  { %v355_v31 = vpop.permute.xlu1 %354  ;;  %442 = vrot.lane.b32.xlu2 %v402_v25, %s606_s30 }
 0x18b   :  { %v398_v35 = vmul.f32 %v355_v31, %v799_v45 }
 0x18d   :  { %450 = vrot.lane.b32.xlu1 %v406_v32, %s606_s30  ;;  %434 = vrot.lane.b32.xlu0 %v398_v35, %s606_s30 }
 0x18f   :  { %v359_v33 = vpop.permute.xlu2 %358 }
 0x190   :  { %v400_v28 = vmul.f32 %v359_v33, %v826_v17 }
 0x192   :  { %v357_v36 = vpop.permute.xlu0 %356 }
 0x193   :  { %v399_v37 = vmul.f32 %v357_v36, %v811_v58 }
 0x195   :  { %436 = vrot.lane.b32.xlu2 %v399_v37, %s606_s30  ;;  %444 = vrot.lane.b32.xlu1 %v403_v42, %s606_s30 }
 0x196   :  { %428 = vrot.lane.b32.xlu0 %v395_v27, %s606_s30 }
 0x197   :  { %v373_v51 = vpop.permute.xlu1 %372  ;;  %v353_v50 = vpop.permute.xlu2 %352 }
 0x198   :  { %v397_v39 = vmul.f32 %v353_v50, %v833_v34  ;;  %v407_v47 = vmul.f32 %v373_v51, %v815_v2 }
 0x19a   :  { %v351_v45 = vpop.permute.xlu0 %350 }
 0x19b   :  { %v396_v38 = vmul.f32 %v351_v45, %v823_v10 }
 0x19d   :  { %430 = vrot.lane.b32.xlu2 %v396_v38, %s606_s30  ;;  %438 = vrot.lane.b32.xlu1 %v400_v28, %s606_s30 }
 0x19f   :  { %v367_v58 = vpop.permute.xlu1 %366  ;;  %v377_v41 = vpop.permute.xlu2 %376 }
 0x1a0   :  { %v404_v56 = vmul.f32 %v367_v58, %v819_v6  ;;  %v409_v46 = vmul.f32 %v377_v41, %v846_v49 }
 0x1a2   :  { %446 = vrot.lane.b32.xlu0 %v404_v56, %s606_s30 }
 0x1a5   :  { %432 = vrot.lane.b32.xlu1 %v397_v39, %s606_s30 }
 0x1a7   :  { %v369_v40 = vpop.permute.xlu0 %368 }
 0x1a8   :  { %v405_v17 = vmul.f32 %v369_v40, %v836_v29 }
 0x1a9   :  { %v361_v43 = vpop.permute.xlu1 %360 }
 0x1aa   :  { %v401_v10 = vmul.f32 %v361_v43, %v842_v44  ;;  %448 = vrot.lane.b32.xlu2 %v405_v17, %s606_s30 }
 0x1ac   :  { %440 = vrot.lane.b32.xlu0 %v401_v10, %s606_s30 }
 0x1ad   :  { %456 = vrot.lane.b32.xlu1 %v409_v46, %s606_s30 }
 0x1af   :  { %v375_v6 = vpop.permute.xlu0 %374 }
 0x1b0   :  { %v408_v34 = vmul.f32 %v375_v6, %v830_v26 }
 0x1b2   :  { %454 = vrot.lane.b32.xlu2 %v408_v34, %s606_s30 }
 0x1b4   :  { %452 = vrot.lane.b32.xlu0 %v407_v47, %s606_s30 }
 0x1e4   :  { %v443_v29 = vpop.permute.xlu2 %442 }
 0x1e5   :  { %483 = vst.msk [vmem:[%s955_s2 + $0x40] sm:$0xff] %vm474_vm2, %v443_v29 }
 0x1ef   :  { %v437_v44 = vpop.permute.xlu2 %436 }
 0x1f0   :  { %480 = vst.msk [vmem:[%s955_s2 + $0x28] sm:$0xff] %vm474_vm2, %v437_v44 }
 0x1f7   :  { %v431_v26 = vpop.permute.xlu2 %430  ;;  %v427_v48 = vpop.permute.xlu1 %426 }
 0x1f8   :  { %477 = vst.msk [vmem:[%s955_s2 + $0x10] sm:$0xff] %vm474_vm2, %v431_v26 }
 0x1f9   :  { %475 = vst.msk [vmem:[%s955_s2] sm:$0xff] %vm474_vm2, %v427_v48 }
 0x1ff   :  { %v435_v2 = vpop.permute.xlu0 %434  ;;  %v451_v49 = vpop.permute.xlu1 %450 }
 0x200   :  { %479 = vst.msk [vmem:[%s955_s2 + $0x20] sm:$0xff] %vm474_vm2, %v435_v2 }
 0x201   :  { %487 = vst.msk [vmem:[%s955_s2 + $0x60] sm:$0xff] %vm474_vm2, %v451_v49 }
 0x204   :  { %v449_v52 = vpop.permute.xlu2 %448 }
 0x205   :  { %486 = vst.msk [vmem:[%s955_s2 + $0x58] sm:$0xff] %vm474_vm2, %v449_v52 }
 0x207   :  { %v445_v53 = vpop.permute.xlu1 %444 }
 0x208   :  { %v429_v54 = vpop.permute.xlu0 %428  ;;  %484 = vst.msk [vmem:[%s955_s2 + $0x48] sm:$0xff] %vm474_vm2, %v445_v53 }
 0x209   :  { %476 = vst.msk [vmem:[%s955_s2 + $0x8] sm:$0xff] %vm474_vm2, %v429_v54 }
 0x20c   :  { %v455_v55 = vpop.permute.xlu2 %454 }
 0x20d   :  { %489 = vst.msk [vmem:[%s955_s2 + $0x70] sm:$0xff] %vm474_vm2, %v455_v55 }
 0x20f   :  { %v439_v57 = vpop.permute.xlu1 %438 }
 0x210   :  { %481 = vst.msk [vmem:[%s955_s2 + $0x30] sm:$0xff] %vm474_vm2, %v439_v57 }
 0x214   :  { %v447_v59 = vpop.permute.xlu0 %446 }
 0x215   :  { %485 = vst.msk [vmem:[%s955_s2 + $0x50] sm:$0xff] %vm474_vm2, %v447_v59 }
 0x217   :  { %v433_v60 = vpop.permute.xlu1 %432 }
 0x218   :  { %478 = vst.msk [vmem:[%s955_s2 + $0x18] sm:$0xff] %vm474_vm2, %v433_v60 }
 0x21e   :  { %v441_v61 = vpop.permute.xlu0 %440 }
 0x21f   :  { %482 = vst.msk [vmem:[%s955_s2 + $0x38] sm:$0xff] %vm474_vm2, %v441_v61  ;;  %v457_v62 = vpop.permute.xlu1 %456 }
 0x220   :  { %490 = vst.msk [vmem:[%s955_s2 + $0x78] sm:$0xff] %vm474_vm2, %v457_v62 }
 0x226   :  { %v453_v63 = vpop.permute.xlu0 %452 }
 0x227   :  { %488 = vst.msk [vmem:[%s955_s2 + $0x68] sm:$0xff] %vm474_vm2, %v453_v63 }

</bundles_post_ra>
